<compile_context>
chip_gen: v6e
topology: v6e:2x2x1
jax: 0.10.0
libtpu: 0.0.40
codegen_flags: <defaults>
</compile_context>

<pallas_src>
import functools

import jax
import jax.numpy as jnp
from jax.experimental import pallas as pl
from jax.experimental.pallas import tpu as pltpu


# --------------------------------------------------------------------------- #
# Hardware-aware configuration
# --------------------------------------------------------------------------- #

_GEN_TOKENS = (
    ("v7", 7), ("7x", 7),
    ("v6", 6),
    ("v5 lite", 5), ("v5e", 5), ("v5", 5), ("v4", 5),
    ("v3", 3), ("v2", 3),
)


def _tpu_generation():
    try:
        kind = jax.devices()[0].device_kind.lower()
    except Exception:  # pragma: no cover - defensive
        return 0
    for tok, gen in _GEN_TOKENS:
        if tok in kind:
            return gen
    return 0


def _hw_config():
    gen = _tpu_generation()
    if gen >= 7:
        # v7x: 64 MiB VMEM per TensorCore; keep >= 2 tiles for the 2-core grid.
        return dict(budget=40 << 20, vmem_limit=48 << 20,
                    bf16_compute=True, split_cores=True)
    if gen == 6:
        # v6e: 128 MiB VMEM, HBM-bound -> large (8-16 MiB) lane-dense blocks.
        return dict(budget=80 << 20, vmem_limit=96 << 20,
                    bf16_compute=True, split_cores=False)
    if gen == 5:
        # v5e / v4 / v5p: raise the 16 MiB scoped default, no bf16 VALU/EUP path.
        return dict(budget=40 << 20, vmem_limit=64 << 20,
                    bf16_compute=False, split_cores=False)
    # v2 / v3 / unknown: stay inside the default scoped VMEM.
    return dict(budget=8 << 20, vmem_limit=None,
                bf16_compute=False, split_cores=False)


def _pick_tile_n(n, c, in_itemsize, budget_bytes, split_cores):
    """Largest multiple-of-8 tile_n whose total VMEM footprint fits the budget."""
    n_padded = ((n + 7) // 8) * 8
    per_row = (
        2 * c * in_itemsize      # double-buffered input logits block
        + 4 * c * 4              # ~4 full-tile f32-equivalent in-kernel temporaries
        + 2 * 128 * 4            # (tile_n, 1) int32 targets pads to 128 lanes, x2 bufs
    )
    tile_n = max(8, (int(budget_bytes // per_row) // 8) * 8)
    if split_cores:
        # Ensure >= 2 tiles so the "parallel" grid can shard across both cores.
        half = (((n_padded + 1) // 2) + 7) // 8 * 8
        tile_n = min(tile_n, max(8, half))
    return min(tile_n, n_padded)


# --------------------------------------------------------------------------- #
# Kernel
# --------------------------------------------------------------------------- #

def _focal_loss_kernel(logits_ref, targets_ref, partial_ref, *,
                       alpha, gamma, n_total, bf16_compute):
    pid = pl.program_id(0)
    tn, c = logits_ref.shape
    tgt = targets_ref[...]                                 # (TILE_N, 1) int32

    compute_in_bf16 = bf16_compute and logits_ref.dtype == jnp.bfloat16
    if compute_in_bf16:
        logits = logits_ref[...]                           # cast-free bf16 pipeline
    else:
        logits = logits_ref[...].astype(jnp.float32)

    # Row-validity mask: the last tile may be padded past N with garbage rows.
    row_ids = jax.lax.broadcasted_iota(jnp.int32, (tn, 1), 0)
    valid = (pid * tn + row_ids) < n_total

    # ---- per-element work (the HBM-rate-critical part) ----
    m = jnp.max(logits, axis=-1, keepdims=True)            # native dtype
    e = jnp.exp(logits - m)                                 # bf16 EUP on v6e/v7x
    sum_exp = jnp.sum(e, axis=-1, keepdims=True, dtype=jnp.float32)

    # Target-logit gather via compare + select + row-sum (no float one-hot).
    class_ids = jax.lax.broadcasted_iota(jnp.int32, (tn, c), 1)
    tgt_logit = jnp.sum(
        jnp.where(class_ids == tgt, logits, 0.0), axis=-1, keepdims=True
    ).astype(jnp.float32)

    # ---- per-row work (cheap, all f32) ----
    # ce == logsumexp(logits) - logits[target]  (== F.cross_entropy per sample).
    # ce >= 0 mathematically; the clamp only guards fp rounding (avoids pt > 1).
    lse = jnp.log(sum_exp) + m.astype(jnp.float32)
    ce = jnp.maximum(lse - tgt_logit, 0.0)

    pt = jnp.exp(-ce)
    one_m_pt = jnp.maximum(1.0 - pt, 0.0)

    g = float(gamma)
    if g == 0.0:
        w = jnp.ones_like(one_m_pt)
    elif g == int(g) and 0 < g <= 8:
        w = one_m_pt
        for _ in range(int(g) - 1):                         # integer-gamma fast path:
            w = w * one_m_pt                                # pure VPU multiplies, no pow
    else:
        # Fractional gamma: guarded exp(g*log(x)) so there is no NaN path.
        w = jnp.exp(g * jnp.log(jnp.maximum(one_m_pt, 1e-30)))

    focal = jnp.float32(alpha) * w * ce                     # (TILE_N, 1)
    focal = jnp.where(valid, focal, 0.0)

    # Lane-dense, unmasked store of this tile's partial sum broadcast over the
    # whole (1, 8, 128) block -> the wrapper can do a fully contiguous sum.
    partial = jnp.sum(focal)
    partial_ref[...] = jnp.broadcast_to(partial, partial_ref.shape).astype(jnp.float32)


# --------------------------------------------------------------------------- #
# Wrapper
# --------------------------------------------------------------------------- #

def focal_loss(outputs, targets, alpha=1.0, gamma=2.0, tile_n=None):
    """outputs: [N, C] logits (f32 or bf16); targets: int [N] class ids -> f32 scalar.

    NOTE: targets must be valid class ids in [0, C); out-of-range ids (e.g.
    PyTorch ignore_index=-100) silently contribute a wrong CE, matching neither
    framework's semantics.  For tiny problems (N*C well below ~1e5 elements)
    the fused pure-JAX path (focal_loss_ref) beats any kernel launch.
    """
    n, c = outputs.shape
    cfg = _hw_config()
    if tile_n is None:
        tile_n = _pick_tile_n(n, c, jnp.dtype(outputs.dtype).itemsize,
                              cfg["budget"], cfg["split_cores"])
    num_tiles = -(-n // tile_n)

    targets_2d = targets.astype(jnp.int32).reshape(n, 1)

    kernel = functools.partial(
        _focal_loss_kernel,
        alpha=float(alpha), gamma=float(gamma),
        n_total=n, bf16_compute=cfg["bf16_compute"],
    )

    partials = pl.pallas_call(
        kernel,
        grid=(num_tiles,),
        in_specs=[
            # Do NOT upcast in the wrapper: bf16 logits stream at half the HBM
            # traffic; any needed f32 cast happens inside the kernel.
            pl.BlockSpec((tile_n, c), lambda i: (i, 0)),   # classes stay on lanes
            pl.BlockSpec((tile_n, 1), lambda i: (i, 0)),
        ],
        out_specs=pl.BlockSpec((1, 8, 128), lambda i: (i, 0, 0)),
        out_shape=jax.ShapeDtypeStruct((num_tiles, 8, 128), jnp.float32),
        compiler_params=pltpu.CompilerParams(
            # Per-tile partial sums -> no carried accumulator -> the batch axis
            # can shard across TensorCores (megacore / v7x friendly).
            dimension_semantics=("parallel",),
            vmem_limit_bytes=cfg["vmem_limit"],
        ),
    )(outputs, targets_2d)

    # Contiguous final reduction: every element of a tile's (8,128) block holds
    # that tile's partial sum, so sum the whole array and rescale.
    return jnp.sum(partials) / jnp.float32(n * 8 * 128)


def focal_loss_ref(outputs, targets, alpha=1.0, gamma=2.0):
    # Pure-JAX reference mirroring F.cross_entropy(reduction='none') + focal
    # weighting.
    logits = outputs.astype(jnp.float32)
    lse = jax.nn.logsumexp(logits, axis=-1)
    tgt_logit = jnp.take_along_axis(
        logits, targets[:, None].astype(jnp.int32), axis=-1
    )[:, 0]
    ce = jnp.maximum(lse - tgt_logit, 0.0)
    pt = jnp.exp(-ce)
    w = jnp.power(jnp.maximum(1.0 - pt, 0.0), gamma)
    return jnp.mean(alpha * w * ce)


if __name__ == "__main__":
    key = jax.random.PRNGKey(0)
    k1, k2, k3, k4, k5, k6 = jax.random.split(key, 6)

    # Small classification head: 8 samples, 32 classes (single tile, f32).
    N, C = 8, 32
    outputs = jax.random.normal(k1, (N, C), dtype=jnp.float32)
    targets = jax.random.randint(k2, (N,), 0, C, dtype=jnp.int32)

    loss = focal_loss(outputs, targets, alpha=1.0, gamma=2.0)
    jax.block_until_ready(loss)
    ref = focal_loss_ref(outputs, targets, alpha=1.0, gamma=2.0)
    assert jnp.allclose(loss, ref, atol=1e-5, rtol=1e-5), (loss, ref)

    # Multi-tile path with a ragged last tile (exercises the "parallel" grid,
    # the per-tile partial sums, and the row-validity masking).
    N2, C2 = 200, 128
    outputs2 = jax.random.normal(k3, (N2, C2), dtype=jnp.float32)
    targets2 = jax.random.randint(k4, (N2,), 0, C2, dtype=jnp.int32)

    loss2 = focal_loss(outputs2, targets2, alpha=0.25, gamma=2.0, tile_n=64)
    jax.block_until_ready(loss2)
    ref2 = focal_loss_ref(outputs2, targets2, alpha=0.25, gamma=2.0)
    assert jnp.allclose(loss2, ref2, atol=1e-5, rtol=1e-5), (loss2, ref2)

    # bf16 streaming path with auto (dtype/generation-aware) tiling.  On v6e/v7x
    # the per-element pipeline runs in bf16, so compare at a looser tolerance.
    N3, C3 = 256, 64
    outputs3 = jax.random.normal(k5, (N3, C3), dtype=jnp.float32).astype(jnp.bfloat16)
    targets3 = jax.random.randint(k6, (N3,), 0, C3, dtype=jnp.int32)

    loss3 = focal_loss(outputs3, targets3, alpha=1.0, gamma=2.0)
    jax.block_until_ready(loss3)
    ref3 = focal_loss_ref(outputs3, targets3, alpha=1.0, gamma=2.0)
    assert jnp.allclose(loss3, ref3, atol=1e-3, rtol=2e-2), (loss3, ref3)

    print("KERNEL_OK")
</pallas_src>

<mosaic_0001>
module attributes {stable_mosaic.version = 11 : i64} {
  func.func @_focal_loss_kernel(%arg0: i32, %arg1: memref<8x32xf32, #tpu.memory_space<vmem>>, %arg2: memref<8x1xi32, #tpu.memory_space<vmem>>, %arg3: memref<1x8x128xf32, #tpu.memory_space<vmem>>) attributes {dimension_semantics = [#tpu.dimension_semantics<parallel>], iteration_bounds = array<i64: 1>, scalar_prefetch = 0 : i64, scratch_operands = 0 : i64, tpu.core_type = #tpu.core_type<tc>, window_params = [{transform_indices = @transform_0, window_bounds = array<i64: 8, 32>}, {transform_indices = @transform_1, window_bounds = array<i64: 8, 1>}, {transform_indices = @transform_2, window_bounds = array<i64: 1, 8, 128>}]} {
    %c0 = arith.constant 0 : index
    %c0_0 = arith.constant 0 : index
    %0 = vector.load %arg2[%c0, %c0_0] : memref<8x1xi32, #tpu.memory_space<vmem>>, vector<8x1xi32>
    %c0_1 = arith.constant 0 : index
    %c0_2 = arith.constant 0 : index
    %1 = vector.load %arg1[%c0_1, %c0_2] : memref<8x32xf32, #tpu.memory_space<vmem>>, vector<8x32xf32>
    %2 = tpu.iota {dimensions = array<i32: 0>} : vector<8x1xi32>
    %c8_i32 = arith.constant 8 : i32
    %3 = arith.muli %arg0, %c8_i32 : i32
    %4 = vector.broadcast %3 : i32 to vector<8x1xi32>
    %5 = arith.addi %4, %2 : vector<8x1xi32>
    %c8_i32_3 = arith.constant 8 : i32
    %6 = vector.broadcast %c8_i32_3 : i32 to vector<8x1xi32>
    %7 = arith.cmpi slt, %5, %6 : vector<8x1xi32>
    %cst = arith.constant dense<0xFF800000> : vector<8xf32>
    %8 = vector.multi_reduction <maximumf>, %1, %cst [1] : vector<8x32xf32> to vector<8xf32>
    %9 = vector.shape_cast %8 : vector<8xf32> to vector<8x1xf32>
    %10 = vector.broadcast %9 : vector<8x1xf32> to vector<8x32xf32>
    %11 = arith.subf %1, %10 : vector<8x32xf32>
    %12 = math.exp %11 : vector<8x32xf32>
    %cst_4 = arith.constant dense<0.000000e+00> : vector<8xf32>
    %13 = vector.multi_reduction <add>, %12, %cst_4 [1] : vector<8x32xf32> to vector<8xf32>
    %14 = vector.shape_cast %13 : vector<8xf32> to vector<8x1xf32>
    %15 = tpu.iota {dimensions = array<i32: 1>} : vector<8x32xi32>
    %16 = vector.broadcast %0 : vector<8x1xi32> to vector<8x32xi32>
    %17 = arith.cmpi eq, %15, %16 : vector<8x32xi32>
    %cst_5 = arith.constant 0.000000e+00 : f32
    %18 = vector.broadcast %cst_5 : f32 to vector<8x32xf32>
    %19 = arith.select %17, %1, %18 : vector<8x32xi1>, vector<8x32xf32>
    %cst_6 = arith.constant dense<0.000000e+00> : vector<8xf32>
    %20 = vector.multi_reduction <add>, %19, %cst_6 [1] : vector<8x32xf32> to vector<8xf32>
    %21 = vector.shape_cast %20 : vector<8xf32> to vector<8x1xf32>
    %22 = math.log %14 : vector<8x1xf32>
    %23 = arith.addf %22, %9 : vector<8x1xf32>
    %24 = arith.subf %23, %21 : vector<8x1xf32>
    %cst_7 = arith.constant 0.000000e+00 : f32
    %25 = vector.broadcast %cst_7 : f32 to vector<8x1xf32>
    %26 = arith.maximumf %24, %25 : vector<8x1xf32>
    %cst_8 = arith.constant 0.000000e+00 : f32
    %27 = vector.broadcast %cst_8 : f32 to vector<8x1xf32>
    %28 = arith.subf %27, %26 : vector<8x1xf32>
    %29 = math.exp %28 : vector<8x1xf32>
    %cst_9 = arith.constant 1.000000e+00 : f32
    %30 = vector.broadcast %cst_9 : f32 to vector<8x1xf32>
    %31 = arith.subf %30, %29 : vector<8x1xf32>
    %cst_10 = arith.constant 0.000000e+00 : f32
    %32 = vector.broadcast %cst_10 : f32 to vector<8x1xf32>
    %33 = arith.maximumf %31, %32 : vector<8x1xf32>
    %34 = arith.mulf %33, %33 : vector<8x1xf32>
    %cst_11 = arith.constant 1.000000e+00 : f32
    %35 = vector.broadcast %cst_11 : f32 to vector<8x1xf32>
    %36 = arith.mulf %35, %34 : vector<8x1xf32>
    %37 = arith.mulf %36, %26 : vector<8x1xf32>
    %cst_12 = arith.constant 0.000000e+00 : f32
    %38 = vector.broadcast %cst_12 : f32 to vector<8x1xf32>
    %39 = arith.select %7, %37, %38 : vector<8x1xi1>, vector<8x1xf32>
    %40 = vector.shape_cast %39 : vector<8x1xf32> to vector<1x8x1xf32>
    %cst_13 = arith.constant dense<0.000000e+00> : vector<1xf32>
    %41 = vector.multi_reduction <add>, %40, %cst_13 [1, 2] : vector<1x8x1xf32> to vector<1xf32>
    %42 = vector.shape_cast %41 : vector<1xf32> to vector<1x1x1xf32>
    %43 = vector.extract %42[0, 0, 0] : f32 from vector<1x1x1xf32>
    %44 = vector.broadcast %43 : f32 to vector<1x8x128xf32>
    %c0_14 = arith.constant 0 : index
    %c0_15 = arith.constant 0 : index
    %c0_16 = arith.constant 0 : index
    %45 = vector.load %arg3[%c0_14, %c0_15, %c0_16] : memref<1x8x128xf32, #tpu.memory_space<vmem>>, vector<1x8x128xf32>
    tpu.vector_store %arg3[%c0_14, %c0_15, %c0_16], %44 {strides = array<i32>} : memref<1x8x128xf32, #tpu.memory_space<vmem>>, vector<1x8x128xf32>,
    return
  }
  func.func @transform_0(%arg0: i32) -> (i32, i32) {
    %c0_i32 = arith.constant 0 : i32
    %c0_i32_0 = arith.constant 0 : i32
    return %arg0, %c0_i32 : i32, i32
  }
  func.func @transform_1(%arg0: i32) -> (i32, i32) {
    %c0_i32 = arith.constant 0 : i32
    %c0_i32_0 = arith.constant 0 : i32
    return %arg0, %c0_i32 : i32, i32
  }
  func.func @transform_2(%arg0: i32) -> (i32, i32, i32) {
    %c0_i32 = arith.constant 0 : i32
    %c0_i32_0 = arith.constant 0 : i32
    %c0_i32_1 = arith.constant 0 : i32
    return %arg0, %c0_i32, %c0_i32_0 : i32, i32, i32
  }
}

</mosaic_0001>

<bundles_post_ra>
// kernel: tpu_custom_call.1
= control target key start
LH: loop header
LB: loop body
LE: loop exit
PB: predicated region body
PF: predicated region fallthrough
CT: control target
= control target key end

     0   :  { %vm20_vm0 = vcmask 261120   ;;  %s142_s0 = inlined_call_operand.vmem [shape: f32[8,32], index: 0, kind: input, shape index: {}]   ;;  %s143_s1 = inlined_call_operand.vmem [shape: s32[8,1], index: 1, kind: input, shape index: {}]   ;;  %s144_s2 = inlined_call_operand.hbm [shape: f32[1,8,128], index: 2, kind: output, shape index: {}]  }
   0x1   :  { %v13_v0 = vld [vmem:[%s142_s0] sm:$0xff] }
   0x2   :  { %7 = vsyncpa [#allocation3], 0  ;;  %v21_v1 = vsel %vm20_vm0, %v13_v0, -inf  ;;  %v113_v2 = vmov 0   ;;  %v12_v3 = vld [vmem:[%s143_s1] sm:$0xff]  ;;  %v30_v7 = vlaneseq  ;;  %vm53_vm2 = vcmask 7168  }
   0x3   :  { %84 = vset.pattern.permute.xlu0 %v113_v2  ;;  %s114_s0 = smov [#allocation2]  }
   0x4   :  { %22 = vmax.xlane.f32.xlu0 %v21_v1  ;;  %v31_v8 = vand.u32 127, %v30_v7  ;;  %s72_s1 = sshll.u32 %s114_s0, 4  ;;  %s73_s1 = int_to_ptr.vmem [resolvable:$true] %s72_s1 }
   0x5   :  { %s91_s14 = scalar_lea.vmem %s73_s1, 128  ;;  %p96_p1 = scmp.lt.s32.totalorder %s73_s1, %s73_s1 }
   0x6   :  { %p92_p0 = scmp.ne.s32.totalorder %s73_s1, %s91_s14  ;;  %p97_p2 = scmp.lt.s32.totalorder %s91_s14, %s91_s14 }
   0x8   :  { %p98_p3 = por %p97_p2, %p96_p1 }
   0xa   :  { %p99_p4 = pnand %p98_p3, %p92_p0 }
  0x1a   :  { %33 = vperm.xlu0 %84, %v12_v3  }
  0x8d   :  { %v23_v4 = vpop.xlane.xlu0 %22 }
  0x8e   :  { %v24_v5 = vsub.f32 %v13_v0, %v23_v4 }
  0x90   :  { %v25_v6 = vmul.f32 1.442695, %v24_v5 }
  0x92   :  { %85 = vpow2.f32 %v25_v6 }
  0x95   :  { %v34_v9 = vpop.permute.xlu0 %33 }
  0x96   :  { %vm35_vm1 = vcmp.eq.s32.totalorder %v31_v8, %v34_v9 }
  0x97   :  { %v36_v11 = vsel %vm35_vm1, %v13_v0, 0.0 }
  0x98   :  { %v37_v13 = vsel %vm20_vm0, %v36_v11, 0.0 }
  0x9f   :  { %v86_v10 = vpop.eup %85 }
  0xa0   :  { %v27_v12 = vsel %vm20_vm0, %v86_v10, 0.0 }
  0xa1   :  { %28 = vadd.xlane.f32.xlu1 %v27_v12 }
  0xa5   :  { %38 = vadd.xlane.f32.xlu1 %v37_v13 }
 0x12a   :  { %v29_v14 = vpop.xlane.xlu1 %28 }
 0x12b   :  { %87 = vlog2.f32 %v29_v14 }
 0x12e   :  { %v39_v17 = vpop.xlane.xlu1 %38 }
 0x138   :  { %v88_v15 = vpop.eup %87 }
 0x139   :  { %v41_v16 = vmul.f32 0.6931472, %v88_v15 }
 0x13b   :  { %v42_v18 = vadd.f32 %v41_v16, %v23_v4 }
 0x13d   :  { %v43_v19 = vsub.f32 %v42_v18, %v39_v17 }
 0x13f   :  { %v44_v20 = vmax.f32 %v43_v19, 0.0 }
 0x141   :  { %v45_v21 = vsub.f32 0.0, %v44_v20 }
 0x143   :  { %v46_v22 = vmul.f32 1.442695, %v45_v21 }
 0x145   :  { %89 = vpow2.f32 %v46_v22 }
 0x152   :  { %v90_v23 = vpop.eup %89 }
 0x153   :  { %v48_v24 = vsub.f32 1.0, %v90_v23 }
 0x155   :  { %v49_v25 = vmax.f32 %v48_v24, 0.0 }
 0x157   :  { %v50_v26 = vmul.f32 %v49_v25, %v49_v25 }
 0x159   :  { %v51_v27 = vmul.f32 %v50_v26, %v44_v20 }
 0x15b   :  { %v54_v28 = vsel %vm53_vm2, %v51_v27, 0.0 }
 0x15c   :  { %55 = vadd.xlane.f32.xlu1 %v54_v28 }
 0x1e5   :  { %v56_v29 = vpop.xlane.xlu1 %55 }
 0x1e6   :  { %v57_v30 = vrot.slane %v56_v29, 4 }
 0x1e8   :  { %v58_v31 = vadd.f32 %v57_v30, %v56_v29 }
 0x1ea   :  { %v59_v32 = vrot.slane %v58_v31, 2 }
 0x1ec   :  { %v60_v33 = vadd.f32 %v59_v32, %v58_v31 }
 0x1ee   :  { %v61_v34 = vrot.slane %v60_v33, 1 }
 0x1f0   :  { %v62_v35 = vadd.f32 %v61_v34, %v60_v33 }
 0x1f2   :  { %80 = vpush %v62_v35 }
 0x223   :  { %s81_s13 = spop %80 }
 0x224   :  { %v64_v36 = vstv %s81_s13 }
 0x225   :  { %65 = vst [vmem:[#allocation2] sm:$0xff] %v64_v36 }
 0x226   :  { %102 = shalt.err (!%p99_p4)
}
 0x227   :  { %75 = dma.vmem_to_hbm [thread:$0]  %s73_s1, 128, %s144_s2, [#allocation3]  }
 0x228   :  { %111 = dma.done.wait [#allocation3], 128  }
 0x229   :  { %112 = vsyncadd [#allocation3], 4294967168 }
 0x22a   :  { %79 = vsyncpa [#allocation3], 1 }

</bundles_post_ra>
